<compile_context>
chip_gen: v5e
topology: v5e:2x2
jax: 0.10.0
libtpu: 0.0.40
codegen_flags: <defaults>
</compile_context>

<pallas_src>
import functools

import jax
import jax.numpy as jnp
from jax.experimental import pallas as pl
from jax.experimental.pallas import tpu as pltpu

_MM_DTYPE = jnp.bfloat16   # MXU operand dtype (accumulation is always f32)


# ---------------------------------------------------------------------------
# Kernel
# ---------------------------------------------------------------------------
def _add_gen_block_kernel(x_ref, sh1_ref, m1_ref, b1_ref, m2_ref, b2_ref,
                          savg_ref, o_ref, *, h2):
    """Fused 2x nearest upsample + (3x3 conv + bias + PixelNorm + LReLU) x 2.

    Lane-merged activation layout: rows = n*H + h, lanes = w*C + c.

    x_ref   : (N*H,  W*Cin)        bf16 input rows (all batch elements stacked)
    sh1_ref : (3, N*2H, N*H)       bf16 0/1 block-diag: H-upsample ∘ dy shift ∘ H pad
    m1_ref  : (W*Cin, 3*2W*Cout)   bf16 conv1 weights; W-upsample + dx taps folded,
                                   dy taps concatenated along the output axis
    b1_ref  : (1, 2W*Cout)         f32 conv1 bias tiled across W
    m2_ref  : (2W*Cout, 3*2W*Cout) bf16 conv2 banded weights, dy-concatenated
    b2_ref  : (1, 2W*Cout)         f32 conv2 bias tiled across W
    savg_ref: (2W*Cout, 2W*Cout)   bf16 block-diag per-pixel channel-mean matrix
    o_ref   : (N*2H, 2W*Cout)      f32 lane-dense output rows
    h2      : static rows-per-image (2H) for the roll boundary mask
    """
    f32 = jnp.float32
    rows = o_ref.shape[0]          # N * 2H
    nl = o_ref.shape[1]            # 2W * Cout
    savg = savg_ref[...]

    def pixelnorm_lrelu(acc):
        # PixelNorm: per-pixel mean over that pixel's Cout lanes via a
        # block-diagonal averaging matmul (bf16, entries 1/C exact for C=2^k),
        # rsqrt on the EUP slot, then LeakyReLU(0.2) on the VPU.
        msq = jnp.dot((acc * acc).astype(_MM_DTYPE), savg,
                      preferred_element_type=f32)
        y = acc * jax.lax.rsqrt(msq + 1e-8)
        return jnp.where(y > 0, y, 0.2 * y)

    # ---- layer 1: 2x upsample + conv1 + bias + PixelNorm + LeakyReLU --------
    # One fused dot over all dy taps (K = W*Cin, N = 3*2W*Cout); the H-upsample
    # + dy row selection (incl. zero padding in H) are exact 0/1 bf16 matmuls.
    t1 = jnp.dot(x_ref[...], m1_ref[...],
                 preferred_element_type=f32).astype(_MM_DTYPE)    # (N*H, 3*nl)
    acc = jnp.zeros((rows, nl), f32)
    for dy in range(3):
        acc = acc + jnp.dot(sh1_ref[dy], t1[:, dy * nl:(dy + 1) * nl],
                            preferred_element_type=f32)
    y1 = pixelnorm_lrelu(acc + b1_ref[...])

    # ---- layer 2: conv2 + bias + PixelNorm + LeakyReLU ----------------------
    # One fused dot over all dy taps (K = 2W*Cout, N = 3*2W*Cout); the dy row
    # shifts are sublane rolls of the tile-aligned 128-lane slices and the H
    # zero-padding (incl. batch-image boundaries) is a VPU mask.
    t2 = jnp.dot(y1.astype(_MM_DTYPE), m2_ref[...],
                 preferred_element_type=f32)                      # (rows, 3*nl)
    r_mod = jax.lax.broadcasted_iota(jnp.int32, (rows, nl), 0) % h2
    acc = t2[:, nl:2 * nl]                                        # dy=1: no shift
    top = pltpu.roll(t2[:, 0:nl], shift=1, axis=0)                # dy=0: row r-1
    acc = acc + jnp.where(r_mod == 0, 0.0, top)
    bot = pltpu.roll(t2[:, 2 * nl:3 * nl], shift=rows - 1, axis=0)  # dy=2: row r+1
    acc = acc + jnp.where(r_mod == h2 - 1, 0.0, bot)
    y2 = pixelnorm_lrelu(acc + b2_ref[...])

    o_ref[...] = y2.astype(o_ref.dtype)                           # lane-dense store


# ---------------------------------------------------------------------------
# Wrapper-side constant builders (tiny, traced once under jit)
# ---------------------------------------------------------------------------
def _w_upsample_matrix(W, C):
    """(W*C, 2W*C) 0/1 matrix: row @ M == nearest-2x repeat along W (merged lanes)."""
    src = jnp.arange(W * C)
    q = jnp.arange(2 * W * C)
    src_of_q = (q // (2 * C)) * C + (q % C)
    return (src[:, None] == src_of_q[None, :]).astype(jnp.float32)


def _h_upsample_shift_matrices(H, N):
    """(3, N*2H, N*H) 0/1 block-diag: output row r of image n selects input row
    (r + dy - 1) // 2 of the same image when 0 <= r+dy-1 < 2H, else zero."""
    H2 = 2 * H
    xuh = (jnp.arange(H2)[:, None] // 2 ==
           jnp.arange(H)[None, :]).astype(jnp.float32)            # (2H, H)
    r = jnp.arange(H2)[:, None]
    i = jnp.arange(H2)[None, :]
    eye_n = jnp.eye(N, dtype=jnp.float32)
    mats = []
    for dy in range(3):
        sh = (i == r + dy - 1).astype(jnp.float32)                # dy shift + H pad
        mats.append(jnp.kron(eye_n, sh @ xuh))                    # (N*2H, N*H)
    return jnp.stack(mats, 0)


def _conv_band_matrices(w_hwio, w_out):
    """(3, w_out*Cin, w_out*Cout) banded (block-Toeplitz) weight matrices.

    M[dy][wi*Cin + ci, wo*Cout + co] = w[dy, wi - wo + 1, ci, co] when the dx tap
    is in range, else 0 — a merged (w*Cin) row times M[dy] performs all dx taps
    of the 3x3 conv including the zero padding in W.
    """
    kh, kw, cin, cout = w_hwio.shape
    wi = jnp.arange(w_out)
    wo = jnp.arange(w_out)
    dx = wi[:, None] - wo[None, :] + (kw // 2)
    valid = (dx >= 0) & (dx < kw)
    dxc = jnp.clip(dx, 0, kw - 1)
    mats = []
    for dy in range(kh):
        blk = w_hwio[dy][dxc]                                     # (Win, Wout, Cin, Cout)
        blk = jnp.where(valid[:, :, None, None], blk, 0.0)
        mats.append(blk.transpose(0, 2, 1, 3).reshape(w_out * cin, w_out * cout))
    return jnp.stack(mats, 0)


def _group_mean_matrix(w_out, C):
    """(Wout*C, Wout*C): y @ M == per-pixel mean over that pixel's C channel lanes."""
    g = jnp.arange(w_out * C) // C
    return (g[:, None] == g[None, :]).astype(jnp.float32) / C


# ---------------------------------------------------------------------------
# Forward
# ---------------------------------------------------------------------------
def add_gen_block_forward(x_nchw, w1, b1, w2, b2):
    """AddGenBlock.forward. x: (N, Cin, H, W) -> (N, Cout, 2H, 2W)."""
    N, Cin, H, W = x_nchw.shape
    Cout = w1.shape[-1]
    assert w1.shape == (3, 3, Cin, Cout) and b1.shape == (Cout,)
    # conv2 consumes conv1's output; the module only type-checks when equal.
    assert Cin == Cout, "AddGenBlock.forward requires in_channels == out_channels"
    H2, W2 = 2 * H, 2 * W

    # NCHW -> lane-merged rows (row = n*H + h, lane = w*C + c), bf16.
    # When stacking generator blocks, keep this layout across blocks so these
    # transposes (an extra HBM round trip each) disappear from the hot path.
    xm = jnp.transpose(x_nchw, (0, 2, 3, 1)).reshape(N * H, W * Cin).astype(_MM_DTYPE)

    # Constants (all 0/1 selections, 1/C averages, or folded conv weights).
    xuw = _w_upsample_matrix(W, Cin)                              # (W*Cin, 2W*Cin)
    band1 = _conv_band_matrices(w1, W2)                           # (3, 2W*Cin, 2W*Cout)
    m1cat = jnp.concatenate([xuw @ band1[dy] for dy in range(3)],
                            axis=1).astype(_MM_DTYPE)             # (W*Cin, 3*2W*Cout)
    sh1 = _h_upsample_shift_matrices(H, N).astype(_MM_DTYPE)      # (3, N*2H, N*H)
    band2 = _conv_band_matrices(w2, W2)
    m2cat = jnp.concatenate([band2[dy] for dy in range(3)],
                            axis=1).astype(_MM_DTYPE)             # (2W*Cout, 3*2W*Cout)
    b1row = jnp.tile(b1, W2)[None, :].astype(jnp.float32)
    b2row = jnp.tile(b2, W2)[None, :].astype(jnp.float32)
    savg = _group_mean_matrix(W2, Cout).astype(_MM_DTYPE)         # 1/C exact (C=2^k)

    # Gridless call: whole problem (batch folded into M) lives in VMEM once;
    # no per-grid-step overhead, no double-buffered constants.
    out2d = pl.pallas_call(
        functools.partial(_add_gen_block_kernel, h2=H2),
        out_shape=jax.ShapeDtypeStruct((N * H2, W2 * Cout), jnp.float32),
    )(xm, sh1, m1cat, b1row, m2cat, b2row, savg)

    # lane-merged rows -> NHWC -> NCHW (kept only for parity with the PyTorch API).
    return out2d.reshape(N, H2, W2, Cout).transpose(0, 3, 1, 2).astype(x_nchw.dtype)


# ---------------------------------------------------------------------------
# Parameters, pure-JAX reference, test
# ---------------------------------------------------------------------------
def init_params(key, in_channels, out_channels):
    """Deterministic synthetic parameters (Conv2d-style fan_in scaling), HWIO."""
    k1, k2, k3, k4 = jax.random.split(key, 4)
    bound = 1.0 / jnp.sqrt(in_channels * 9)
    w1 = jax.random.uniform(k1, (3, 3, in_channels, out_channels),
                            jnp.float32, -bound, bound)
    b1 = jax.random.uniform(k2, (out_channels,), jnp.float32, -bound, bound)
    w2 = jax.random.uniform(k3, (3, 3, in_channels, out_channels),
                            jnp.float32, -bound, bound)
    b2 = jax.random.uniform(k4, (out_channels,), jnp.float32, -bound, bound)
    return w1, b1, w2, b2


def _reference_forward(x_nchw, w1, b1, w2, b2):
    """Pure-JAX f32 reference of the intended PyTorch forward."""
    y = jnp.repeat(jnp.repeat(x_nchw, 2, axis=2), 2, axis=3)      # nearest 2x

    def block(y, w, b):
        y = jax.lax.conv_general_dilated(
            y, w, window_strides=(1, 1), padding="SAME",
            dimension_numbers=("NCHW", "HWIO", "NCHW"))
        y = y + b[None, :, None, None]
        y = y * jax.lax.rsqrt(jnp.mean(y * y, axis=1, keepdims=True) + 1e-8)
        return jnp.where(y > 0, y, 0.2 * y)

    return block(block(y, w1, b1), w2, b2)


if __name__ == "__main__":
    key = jax.random.PRNGKey(0)
    kx, kp = jax.random.split(key)

    N, C, H, W = 2, 4, 16, 16       # in_channels == out_channels (see assert)
    x = jax.random.normal(kx, (N, C, H, W), jnp.float32)
    w1, b1, w2, b2 = init_params(kp, C, C)

    out = jax.block_until_ready(jax.jit(add_gen_block_forward)(x, w1, b1, w2, b2))
    assert out.shape == (N, C, 2 * H, 2 * W), out.shape
    assert bool(jnp.all(jnp.isfinite(out)))

    # Loose tolerance covers the bf16 MXU-operand casts; a structural bug would
    # produce O(1) errors on the unit-RMS PixelNorm outputs.
    ref = _reference_forward(x, w1, b1, w2, b2)
    max_err = float(jnp.max(jnp.abs(out - ref)))
    assert max_err < 0.1, f"max abs error vs reference = {max_err}"
    print("KERNEL_OK")
</pallas_src>

<mosaic_0001>
module attributes {stable_mosaic.version = 11 : i64} {
  func.func @_add_gen_block_kernel(%arg0: memref<32x64xbf16, #tpu.memory_space<vmem>>, %arg1: memref<3x64x32xbf16, #tpu.memory_space<vmem>>, %arg2: memref<64x384xbf16, #tpu.memory_space<vmem>>, %arg3: memref<1x128xf32, #tpu.memory_space<vmem>>, %arg4: memref<128x384xbf16, #tpu.memory_space<vmem>>, %arg5: memref<1x128xf32, #tpu.memory_space<vmem>>, %arg6: memref<128x128xbf16, #tpu.memory_space<vmem>>, %arg7: memref<64x128xf32, #tpu.memory_space<vmem>>) attributes {dimension_semantics = [], scalar_prefetch = 0 : i64, scratch_operands = 0 : i64, tpu.core_type = #tpu.core_type<tc>} {
    %c0 = arith.constant 0 : index
    %c0_0 = arith.constant 0 : index
    %0 = vector.load %arg6[%c0, %c0_0] : memref<128x128xbf16, #tpu.memory_space<vmem>>, vector<128x128xbf16>
    %c0_1 = arith.constant 0 : index
    %c0_2 = arith.constant 0 : index
    %1 = vector.load %arg0[%c0_1, %c0_2] : memref<32x64xbf16, #tpu.memory_space<vmem>>, vector<32x64xbf16>
    %c0_3 = arith.constant 0 : index
    %c0_4 = arith.constant 0 : index
    %2 = vector.load %arg2[%c0_3, %c0_4] : memref<64x384xbf16, #tpu.memory_space<vmem>>, vector<64x384xbf16>
    %cst = arith.constant dense<0.000000e+00> : vector<32x384xf32>
    %3 = tpu.matmul %1, %2, %cst {dimension_numbers = #tpu.dot_dimension_numbers<[1], [0], [0], [1], [0, 0, 1, 1], [], []>} : vector<32x64xbf16>, vector<64x384xbf16>, vector<32x384xf32> -> vector<32x384xf32>
    %4 = arith.truncf %3 : vector<32x384xf32> to vector<32x384xbf16>
    %cst_5 = arith.constant 0.000000e+00 : f32
    %5 = vector.broadcast %cst_5 : f32 to vector<64x128xf32>
    %c0_6 = arith.constant 0 : index
    %c0_7 = arith.constant 0 : index
    %c0_8 = arith.constant 0 : index
    %6 = vector.load %arg1[%c0_6, %c0_7, %c0_8] : memref<3x64x32xbf16, #tpu.memory_space<vmem>>, vector<1x64x32xbf16>
    %7 = vector.shape_cast %6 : vector<1x64x32xbf16> to vector<64x32xbf16>
    %8 = vector.extract_strided_slice %4 {offsets = [0, 0], sizes = [32, 128], strides = [1, 1]} : vector<32x384xbf16> to vector<32x128xbf16>
    %cst_9 = arith.constant dense<0.000000e+00> : vector<64x128xf32>
    %9 = tpu.matmul %7, %8, %cst_9 {dimension_numbers = #tpu.dot_dimension_numbers<[1], [0], [0], [1], [0, 0, 1, 1], [], []>} : vector<64x32xbf16>, vector<32x128xbf16>, vector<64x128xf32> -> vector<64x128xf32>
    %10 = arith.addf %5, %9 : vector<64x128xf32>
    %c1 = arith.constant 1 : index
    %c0_10 = arith.constant 0 : index
    %c0_11 = arith.constant 0 : index
    %11 = vector.load %arg1[%c1, %c0_10, %c0_11] : memref<3x64x32xbf16, #tpu.memory_space<vmem>>, vector<1x64x32xbf16>
    %12 = vector.shape_cast %11 : vector<1x64x32xbf16> to vector<64x32xbf16>
    %13 = vector.extract_strided_slice %4 {offsets = [0, 128], sizes = [32, 128], strides = [1, 1]} : vector<32x384xbf16> to vector<32x128xbf16>
    %cst_12 = arith.constant dense<0.000000e+00> : vector<64x128xf32>
    %14 = tpu.matmul %12, %13, %cst_12 {dimension_numbers = #tpu.dot_dimension_numbers<[1], [0], [0], [1], [0, 0, 1, 1], [], []>} : vector<64x32xbf16>, vector<32x128xbf16>, vector<64x128xf32> -> vector<64x128xf32>
    %15 = arith.addf %10, %14 : vector<64x128xf32>
    %c2 = arith.constant 2 : index
    %c0_13 = arith.constant 0 : index
    %c0_14 = arith.constant 0 : index
    %16 = vector.load %arg1[%c2, %c0_13, %c0_14] : memref<3x64x32xbf16, #tpu.memory_space<vmem>>, vector<1x64x32xbf16>
    %17 = vector.shape_cast %16 : vector<1x64x32xbf16> to vector<64x32xbf16>
    %18 = vector.extract_strided_slice %4 {offsets = [0, 256], sizes = [32, 128], strides = [1, 1]} : vector<32x384xbf16> to vector<32x128xbf16>
    %cst_15 = arith.constant dense<0.000000e+00> : vector<64x128xf32>
    %19 = tpu.matmul %17, %18, %cst_15 {dimension_numbers = #tpu.dot_dimension_numbers<[1], [0], [0], [1], [0, 0, 1, 1], [], []>} : vector<64x32xbf16>, vector<32x128xbf16>, vector<64x128xf32> -> vector<64x128xf32>
    %20 = arith.addf %15, %19 : vector<64x128xf32>
    %c0_16 = arith.constant 0 : index
    %c0_17 = arith.constant 0 : index
    %21 = vector.load %arg3[%c0_16, %c0_17] : memref<1x128xf32, #tpu.memory_space<vmem>>, vector<1x128xf32>
    %22 = vector.broadcast %21 : vector<1x128xf32> to vector<64x128xf32>
    %23 = arith.addf %20, %22 : vector<64x128xf32>
    %24 = arith.mulf %23, %23 : vector<64x128xf32>
    %25 = arith.truncf %24 : vector<64x128xf32> to vector<64x128xbf16>
    %cst_18 = arith.constant dense<0.000000e+00> : vector<64x128xf32>
    %26 = tpu.matmul %25, %0, %cst_18 {dimension_numbers = #tpu.dot_dimension_numbers<[1], [0], [0], [1], [0, 0, 1, 1], [], []>} : vector<64x128xbf16>, vector<128x128xbf16>, vector<64x128xf32> -> vector<64x128xf32>
    %cst_19 = arith.constant 9.99999993E-9 : f32
    %27 = vector.broadcast %cst_19 : f32 to vector<64x128xf32>
    %28 = arith.addf %26, %27 : vector<64x128xf32>
    %29 = math.rsqrt %28 : vector<64x128xf32>
    %30 = arith.mulf %23, %29 : vector<64x128xf32>
    %cst_20 = arith.constant 0.000000e+00 : f32
    %31 = vector.broadcast %cst_20 : f32 to vector<64x128xf32>
    %32 = arith.cmpf ogt, %30, %31 : vector<64x128xf32>
    %cst_21 = arith.constant 2.000000e-01 : f32
    %33 = vector.broadcast %cst_21 : f32 to vector<64x128xf32>
    %34 = arith.mulf %33, %30 : vector<64x128xf32>
    %35 = arith.select %32, %30, %34 : vector<64x128xi1>, vector<64x128xf32>
    %36 = arith.truncf %35 : vector<64x128xf32> to vector<64x128xbf16>
    %c0_22 = arith.constant 0 : index
    %c0_23 = arith.constant 0 : index
    %37 = vector.load %arg4[%c0_22, %c0_23] : memref<128x384xbf16, #tpu.memory_space<vmem>>, vector<128x384xbf16>
    %cst_24 = arith.constant dense<0.000000e+00> : vector<64x384xf32>
    %38 = tpu.matmul %36, %37, %cst_24 {dimension_numbers = #tpu.dot_dimension_numbers<[1], [0], [0], [1], [0, 0, 1, 1], [], []>} : vector<64x128xbf16>, vector<128x384xbf16>, vector<64x384xf32> -> vector<64x384xf32>
    %39 = tpu.iota {dimensions = array<i32: 0>} : vector<64x128xi32>
    %c32_i32 = arith.constant 32 : i32
    %c0_i32 = arith.constant 0 : i32
    %40 = arith.cmpi eq, %c32_i32, %c0_i32 : i32
    %c1_i32 = arith.constant 1 : i32
    %41 = arith.select %40, %c1_i32, %c32_i32 : i32
    %42 = vector.broadcast %41 : i32 to vector<64x128xi32>
    %43 = arith.remsi %39, %42 : vector<64x128xi32>
    %c0_i32_25 = arith.constant 0 : i32
    %44 = vector.broadcast %c0_i32_25 : i32 to vector<64x128xi32>
    %45 = arith.cmpi ne, %43, %44 : vector<64x128xi32>
    %c0_i32_26 = arith.constant 0 : i32
    %46 = vector.broadcast %c0_i32_26 : i32 to vector<64x128xi32>
    %47 = arith.cmpi slt, %43, %46 : vector<64x128xi32>
    %c0_i32_27 = arith.constant 0 : i32
    %48 = arith.cmpi slt, %41, %c0_i32_27 : i32
    %49 = vector.broadcast %48 : i1 to vector<64x128xi1>
    %50 = vector.broadcast %49 : vector<64x128xi1> to vector<64x128xi1>
    %51 = arith.xori %47, %50 : vector<64x128xi1>
    %52 = arith.andi %51, %45 : vector<64x128xi1>
    %53 = vector.broadcast %41 : i32 to vector<64x128xi32>
    %54 = arith.addi %43, %53 : vector<64x128xi32>
    %55 = arith.select %52, %54, %43 : vector<64x128xi1>, vector<64x128xi32>
    %56 = vector.extract_strided_slice %38 {offsets = [0, 128], sizes = [64, 128], strides = [1, 1]} : vector<64x384xf32> to vector<64x128xf32>
    %57 = vector.extract_strided_slice %38 {offsets = [0, 0], sizes = [64, 128], strides = [1, 1]} : vector<64x384xf32> to vector<64x128xf32>
    %c1_i32_28 = arith.constant 1 : i32
    %58 = tpu.dynamic_rotate %57 by %c1_i32_28 dim 0 : vector<64x128xf32>, i32 -> vector<64x128xf32>
    %c0_i32_29 = arith.constant 0 : i32
    %59 = vector.broadcast %c0_i32_29 : i32 to vector<64x128xi32>
    %60 = arith.cmpi eq, %55, %59 : vector<64x128xi32>
    %cst_30 = arith.constant 0.000000e+00 : f32
    %61 = vector.broadcast %cst_30 : f32 to vector<64x128xf32>
    %62 = arith.select %60, %61, %58 : vector<64x128xi1>, vector<64x128xf32>
    %63 = arith.addf %56, %62 : vector<64x128xf32>
    %64 = vector.extract_strided_slice %38 {offsets = [0, 256], sizes = [64, 128], strides = [1, 1]} : vector<64x384xf32> to vector<64x128xf32>
    %c63_i32 = arith.constant 63 : i32
    %65 = tpu.dynamic_rotate %64 by %c63_i32 dim 0 : vector<64x128xf32>, i32 -> vector<64x128xf32>
    %c31_i32 = arith.constant 31 : i32
    %66 = vector.broadcast %c31_i32 : i32 to vector<64x128xi32>
    %67 = arith.cmpi eq, %55, %66 : vector<64x128xi32>
    %cst_31 = arith.constant 0.000000e+00 : f32
    %68 = vector.broadcast %cst_31 : f32 to vector<64x128xf32>
    %69 = arith.select %67, %68, %65 : vector<64x128xi1>, vector<64x128xf32>
    %70 = arith.addf %63, %69 : vector<64x128xf32>
    %c0_32 = arith.constant 0 : index
    %c0_33 = arith.constant 0 : index
    %71 = vector.load %arg5[%c0_32, %c0_33] : memref<1x128xf32, #tpu.memory_space<vmem>>, vector<1x128xf32>
    %72 = vector.broadcast %71 : vector<1x128xf32> to vector<64x128xf32>
    %73 = arith.addf %70, %72 : vector<64x128xf32>
    %74 = arith.mulf %73, %73 : vector<64x128xf32>
    %75 = arith.truncf %74 : vector<64x128xf32> to vector<64x128xbf16>
    %cst_34 = arith.constant dense<0.000000e+00> : vector<64x128xf32>
    %76 = tpu.matmul %75, %0, %cst_34 {dimension_numbers = #tpu.dot_dimension_numbers<[1], [0], [0], [1], [0, 0, 1, 1], [], []>} : vector<64x128xbf16>, vector<128x128xbf16>, vector<64x128xf32> -> vector<64x128xf32>
    %cst_35 = arith.constant 9.99999993E-9 : f32
    %77 = vector.broadcast %cst_35 : f32 to vector<64x128xf32>
    %78 = arith.addf %76, %77 : vector<64x128xf32>
    %79 = math.rsqrt %78 : vector<64x128xf32>
    %80 = arith.mulf %73, %79 : vector<64x128xf32>
    %cst_36 = arith.constant 0.000000e+00 : f32
    %81 = vector.broadcast %cst_36 : f32 to vector<64x128xf32>
    %82 = arith.cmpf ogt, %80, %81 : vector<64x128xf32>
    %cst_37 = arith.constant 2.000000e-01 : f32
    %83 = vector.broadcast %cst_37 : f32 to vector<64x128xf32>
    %84 = arith.mulf %83, %80 : vector<64x128xf32>
    %85 = arith.select %82, %80, %84 : vector<64x128xi1>, vector<64x128xf32>
    %c0_38 = arith.constant 0 : index
    %c0_39 = arith.constant 0 : index
    %86 = vector.load %arg7[%c0_38, %c0_39] : memref<64x128xf32, #tpu.memory_space<vmem>>, vector<64x128xf32>
    tpu.vector_store %arg7[%c0_38, %c0_39], %85 {strides = array<i32>} : memref<64x128xf32, #tpu.memory_space<vmem>>, vector<64x128xf32>,
    return
  }
}

</mosaic_0001>

<bundles_post_ra>
// kernel: tile.13
= control target key start
LH: loop header
LB: loop body
LE: loop exit
PB: predicated region body
PF: predicated region fallthrough
CT: control target
= control target key end

     0   :  { %s40_s0 = inlined_call_operand.vmem [shape: f32[4], index: 0, kind: input, shape index: {}]   ;;  %s41_s1 = inlined_call_operand.vmem [shape: f32[32,4], index: 1, kind: output, shape index: {}]  }
   0x1   :  { %v4_v0 = vld [vmem:[%s40_s0] ss:$0 sm:$0xff] }
   0x2   :  { %5 = vst [vmem:[%s41_s1] sm:$0xff] %v4_v0 }
   0x3   :  { %12 = vst [vmem:[%s41_s1 + $0x8] sm:$0xff] %v4_v0 }
   0x4   :  { %13 = vst [vmem:[%s41_s1 + $0x10] sm:$0xff] %v4_v0 }
   0x5   :  { %14 = vst [vmem:[%s41_s1 + $0x18] sm:$0xff] %v4_v0 }

// kernel: tile.14
= control target key start
LH: loop header
LB: loop body
LE: loop exit
PB: predicated region body
PF: predicated region fallthrough
CT: control target
= control target key end

     0   :  { %s259_s10 = smov 124   ;;  %s260_s11 = smov 116   ;;  %vm3_vm0 = vcmask 31744   ;;  %vm9_vm1 = vcmask 1048544   ;;  %vm15_vm2 = vcmask 1015744   ;;  %vm21_vm3 = vcmask 982944   ;;  %s399_s0 = inlined_call_operand.vmem [shape: f32[32,4], index: 0, kind: input, shape index: {}]   ;;  %s400_s1 = inlined_call_operand.vmem [shape: f32[1,128], index: 1, kind: output, shape index: {}]  }
   0x1   :  { %v197_v0 = vld [vmem:[%s399_s0 + $0x1f] sm:$0x1]   ;;  %v199_v1 = vld [vmem:[%s399_s0 + $0x1d] sm:$0x1]   ;;  %v201_v2 = vld [vmem:[%s399_s0 + $0x1b] sm:$0x1]  }
   0x2   :  { %7 = vrot.lane.b32.xlu0 %v197_v0, %s259_s10  ;;  %19 = vrot.lane.b32.xlu1 %v199_v1, %s260_s11  ;;  %s261_s14 = smov 108   ;;  %v198_v3 = vld [vmem:[%s399_s0 + $0x1e] sm:$0x1]   ;;  %v200_v4 = vld [vmem:[%s399_s0 + $0x1c] sm:$0x1]   ;;  %s262_s19 = smov 120  }
   0x3   :  { %31 = vrot.lane.b32.xlu2 %v201_v2, %s261_s14  ;;  %s263_s20 = smov 112   ;;  %v202_v5 = vld [vmem:[%s399_s0 + $0x1a] sm:$0x1]   ;;  %s264_s23 = smov 104   ;;  %v203_v6 = vld [vmem:[%s399_s0 + $0x19] sm:$0x1]  }
   0x4   :  { %v204_v7 = vld [vmem:[%s399_s0 + $0x18] sm:$0x1]   ;;  %s265_s28 = smov 100   ;;  %s266_s29 = smov 96   ;;  %v205_v8 = vld [vmem:[%s399_s0 + $0x17] sm:$0x1]  }
   0x5   :  { %s267_s3 = smov 92   ;;  %v206_v9 = vld [vmem:[%s399_s0 + $0x16] sm:$0x1]   ;;  %v207_v10 = vld [vmem:[%s399_s0 + $0x15] sm:$0x1]   ;;  %s268_s8 = smov 88  }
   0x6   :  { %s269_s9 = smov 84   ;;  %v208_v11 = vld [vmem:[%s399_s0 + $0x14] sm:$0x1]   ;;  %s270_s12 = smov 80   ;;  %v209_v12 = vld [vmem:[%s399_s0 + $0x13] sm:$0x1]  }
   0x7   :  { %v210_v13 = vld [vmem:[%s399_s0 + $0x12] sm:$0x1]   ;;  %s271_s17 = smov 76   ;;  %s272_s18 = smov 72   ;;  %v211_v14 = vld [vmem:[%s399_s0 + $0x11] sm:$0x1]  }
   0x8   :  { %s273_s21 = smov 68   ;;  %v212_v15 = vld [vmem:[%s399_s0 + $0x10] sm:$0x1]   ;;  %v213_v16 = vld [vmem:[%s399_s0 + $0xf] sm:$0x1]   ;;  %s274_s26 = smov 64  }
   0x9   :  { %s275_s27 = smov 60   ;;  %v214_v17 = vld [vmem:[%s399_s0 + $0xe] sm:$0x1]   ;;  %s276_s30 = smov 56   ;;  %v215_v18 = vld [vmem:[%s399_s0 + $0xd] sm:$0x1]  }
   0xa   :  { %13 = vrot.lane.b32.xlu0 %v198_v3, %s262_s19  ;;  %25 = vrot.lane.b32.xlu1 %v200_v4, %s263_s20  ;;  %v216_v19 = vld [vmem:[%s399_s0 + $0xc] sm:$0x1]   ;;  %s277_s6 = smov 52   ;;  %s278_s7 = smov 48   ;;  %v217_v20 = vld [vmem:[%s399_s0 + $0xb] sm:$0x1]  }
   0xb   :  { %37 = vrot.lane.b32.xlu2 %v202_v5, %s264_s23  ;;  %s279_s10 = smov 44   ;;  %v218_v21 = vld [vmem:[%s399_s0 + $0xa] sm:$0x1]   ;;  %v219_v22 = vld [vmem:[%s399_s0 + $0x9] sm:$0x1]   ;;  %s280_s15 = smov 40  }
   0xc   :  { %s281_s16 = smov 36   ;;  %v220_v23 = vld [vmem:[%s399_s0 + $0x8] sm:$0x1]   ;;  %s282_s19 = smov 32   ;;  %v221_v24 = vld [vmem:[%s399_s0 + $0x7] sm:$0x1]  }
   0xd   :  { %v222_v25 = vld [vmem:[%s399_s0 + $0x6] sm:$0x1]   ;;  %s283_s24 = smov 28   ;;  %s284_s25 = smov 24   ;;  %v223_v26 = vld [vmem:[%s399_s0 + $0x5] sm:$0x1]  }
   0xe   :  { %v224_v27 = vld [vmem:[%s399_s0 + $0x4] sm:$0x1]   ;;  %v225_v28 = vld [vmem:[%s399_s0 + $0x3] sm:$0x1]   ;;  %s286_s4 = smov 16   ;;  %s287_s5 = smov 12  }
   0xf   :  { %v226_v29 = vld [vmem:[%s399_s0 + $0x2] sm:$0x1]   ;;  %v227_v30 = vld [vmem:[%s399_s0 + $0x1] sm:$0x1]   ;;  %s289_s11 = smov 4   ;;  %vm27_vm4 = vcmask 950144  }
  0x10   :  { %v2_v31 = vld [vmem:[%s399_s0] sm:$0x1]   ;;  %vm33_vm5 = vcmask 917344   ;;  %vm39_vm6 = vcmask 884544   ;;  %vm45_vm7 = vcmask 851744   ;;  %vm51_vm8 = vcmask 818944  }
  0x11   :  { %4 = vst.msk [vmem:[#allocation0] sm:$0x1] %vm3_vm0, %v2_v31   ;;  %vm57_vm9 = vcmask 786144   ;;  %vm63_vm10 = vcmask 753344   ;;  %vm69_vm11 = vcmask 720544   ;;  %vm75_vm12 = vcmask 687744  }
  0x12   :  { %43 = vrot.lane.b32.xlu0 %v203_v6, %s265_s28  ;;  %49 = vrot.lane.b32.xlu1 %v204_v7, %s266_s29  ;;  %s285_s28 = smov 20   ;;  %vm81_vm13 = vcmask 654944   ;;  %vm87_vm14 = vcmask 622144   ;;  %vm93_vm15 = vcmask 589344   ;;  %vm99_vm0 = vcmask 556544  }
  0x13   :  { %55 = vrot.lane.b32.xlu2 %v205_v8, %s267_s3 }
  0x1a   :  { %61 = vrot.lane.b32.xlu0 %v206_v9, %s268_s8  ;;  %67 = vrot.lane.b32.xlu1 %v207_v10, %s269_s9  ;;  %s288_s8 = smov 8  }
  0x1b   :  { %73 = vrot.lane.b32.xlu2 %v208_v11, %s270_s12 }
  0x22   :  { %79 = vrot.lane.b32.xlu0 %v209_v12, %s271_s17  ;;  %85 = vrot.lane.b32.xlu1 %v210_v13, %s272_s18 }
  0x23   :  { %91 = vrot.lane.b32.xlu2 %v211_v14, %s273_s21 }
  0x2a   :  { %97 = vrot.lane.b32.xlu0 %v212_v15, %s274_s26  ;;  %103 = vrot.lane.b32.xlu1 %v213_v16, %s275_s27 }
  0x2b   :  { %109 = vrot.lane.b32.xlu2 %v214_v17, %s276_s30 }
  0x32   :  { %115 = vrot.lane.b32.xlu0 %v215_v18, %s277_s6  ;;  %121 = vrot.lane.b32.xlu1 %v216_v19, %s278_s7 }
  0x33   :  { %127 = vrot.lane.b32.xlu2 %v217_v20, %s279_s10 }
  0x3a   :  { %133 = vrot.lane.b32.xlu0 %v218_v21, %s280_s15  ;;  %139 = vrot.lane.b32.xlu1 %v219_v22, %s281_s16 }
  0x3b   :  { %145 = vrot.lane.b32.xlu2 %v220_v23, %s282_s19 }
  0x42   :  { %151 = vrot.lane.b32.xlu0 %v221_v24, %s283_s24  ;;  %157 = vrot.lane.b32.xlu1 %v222_v25, %s284_s25 }
  0x43   :  { %163 = vrot.lane.b32.xlu2 %v223_v26, %s285_s28 }
  0x4a   :  { %169 = vrot.lane.b32.xlu0 %v224_v27, %s286_s4  ;;  %175 = vrot.lane.b32.xlu1 %v225_v28, %s287_s5 }
  0x4b   :  { %181 = vrot.lane.b32.xlu2 %v226_v29, %s288_s8 }
  0x52   :  { %187 = vrot.lane.b32.xlu0 %v227_v30, %s289_s11 }
  0x5d   :  { %v32_v32 = vpop.permute.xlu2 %31  }
  0x65   :  { %v38_v33 = vpop.permute.xlu2 %37  }
  0x6d   :  { %v56_v34 = vpop.permute.xlu2 %55  }
  0x74   :  { %v8_v35 = vpop.permute.xlu0 %7   ;;  %v20_v36 = vpop.permute.xlu1 %19  }
  0x75   :  { %10 = vst.msk [vmem:[#allocation0] sm:$0x1] %vm9_vm1, %v8_v35   ;;  %v74_v37 = vpop.permute.xlu2 %73   ;;  %vm105_vm1 = vcmask 523744  }
  0x7c   :  { %v14_v38 = vpop.permute.xlu0 %13   ;;  %v26_v39 = vpop.permute.xlu1 %25  }
  0x7d   :  { %16 = vst.msk [vmem:[#allocation0] sm:$0x1] %vm15_vm2, %v14_v38   ;;  %v92_v40 = vpop.permute.xlu2 %91   ;;  %vm111_vm2 = vcmask 490944  }
  0x7e   :  { %22 = vst.msk [vmem:[#allocation0] sm:$0x1] %vm21_vm3, %v20_v36   ;;  %vm117_vm3 = vcmask 458144  }
  0x7f   :  { %28 = vst.msk [vmem:[#allocation0] sm:$0x1] %vm27_vm4, %v26_v39   ;;  %vm123_vm4 = vcmask 425344  }
  0x80   :  { %34 = vst.msk [vmem:[#allocation0] sm:$0x1] %vm33_vm5, %v32_v32   ;;  %vm129_vm5 = vcmask 392544  }
  0x81   :  { %40 = vst.msk [vmem:[#allocation0] sm:$0x1] %vm39_vm6, %v38_v33   ;;  %vm135_vm6 = vcmask 359744  }
  0x84   :  { %v44_v41 = vpop.permute.xlu0 %43   ;;  %v50_v42 = vpop.permute.xlu1 %49  }
  0x85   :  { %46 = vst.msk [vmem:[#allocation0] sm:$0x1] %vm45_vm7, %v44_v41   ;;  %v110_v43 = vpop.permute.xlu2 %109   ;;  %vm141_vm7 = vcmask 326944  }
  0x86   :  { %52 = vst.msk [vmem:[#allocation0] sm:$0x1] %vm51_vm8, %v50_v42   ;;  %vm147_vm8 = vcmask 294144  }
  0x87   :  { %58 = vst.msk [vmem:[#allocation0] sm:$0x1] %vm57_vm9, %v56_v34   ;;  %vm153_vm9 = vcmask 261344  }
  0x8c   :  { %v62_v44 = vpop.permute.xlu0 %61   ;;  %v68_v45 = vpop.permute.xlu1 %67  }
  0x8d   :  { %64 = vst.msk [vmem:[#allocation0] sm:$0x1] %vm63_vm10, %v62_v44   ;;  %v128_v46 = vpop.permute.xlu2 %127   ;;  %vm159_vm10 = vcmask 228544  }
  0x8e   :  { %70 = vst.msk [vmem:[#allocation0] sm:$0x1] %vm69_vm11, %v68_v45   ;;  %vm165_vm11 = vcmask 195744  }
  0x8f   :  { %76 = vst.msk [vmem:[#allocation0] sm:$0x1] %vm75_vm12, %v74_v37   ;;  %vm171_vm12 = vcmask 162944  }
  0x94   :  { %v80_v47 = vpop.permute.xlu0 %79   ;;  %v86_v48 = vpop.permute.xlu1 %85  }
  0x95   :  { %82 = vst.msk [vmem:[#allocation0] sm:$0x1] %vm81_vm13, %v80_v47   ;;  %v146_v49 = vpop.permute.xlu2 %145   ;;  %vm177_vm13 = vcmask 130144  }
  0x96   :  { %88 = vst.msk [vmem:[#allocation0] sm:$0x1] %vm87_vm14, %v86_v48   ;;  %vm183_vm14 = vcmask 97344  }
  0x97   :  { %94 = vst.msk [vmem:[#allocation0] sm:$0x1] %vm93_vm15, %v92_v40   ;;  %vm189_vm15 = vcmask 64544  }
  0x9c   :  { %v98_v50 = vpop.permute.xlu0 %97   ;;  %v104_v51 = vpop.permute.xlu1 %103  }
  0x9d   :  { %100 = vst.msk [vmem:[#allocation0] sm:$0x1] %vm99_vm0, %v98_v50   ;;  %v164_v52 = vpop.permute.xlu2 %163  }
  0x9e   :  { %106 = vst.msk [vmem:[#allocation0] sm:$0x1] %vm105_vm1, %v104_v51  }
  0x9f   :  { %112 = vst.msk [vmem:[#allocation0] sm:$0x1] %vm111_vm2, %v110_v43  }
  0xa4   :  { %v116_v53 = vpop.permute.xlu0 %115   ;;  %v122_v54 = vpop.permute.xlu1 %121  }
  0xa5   :  { %118 = vst.msk [vmem:[#allocation0] sm:$0x1] %vm117_vm3, %v116_v53   ;;  %v182_v55 = vpop.permute.xlu2 %181  }
  0xa6   :  { %124 = vst.msk [vmem:[#allocation0] sm:$0x1] %vm123_vm4, %v122_v54  }
  0xa7   :  { %130 = vst.msk [vmem:[#allocation0] sm:$0x1] %vm129_vm5, %v128_v46  }
  0xac   :  { %v134_v56 = vpop.permute.xlu0 %133   ;;  %v140_v57 = vpop.permute.xlu1 %139  }
  0xad   :  { %136 = vst.msk [vmem:[#allocation0] sm:$0x1] %vm135_vm6, %v134_v56  }
  0xae   :  { %142 = vst.msk [vmem:[#allocation0] sm:$0x1] %vm141_vm7, %v140_v57  }
  0xaf   :  { %148 = vst.msk [vmem:[#allocation0] sm:$0x1] %vm147_vm8, %v146_v49  }
  0xb4   :  { %v152_v58 = vpop.permute.xlu0 %151   ;;  %v158_v59 = vpop.permute.xlu1 %157  }
  0xb5   :  { %154 = vst.msk [vmem:[#allocation0] sm:$0x1] %vm153_vm9, %v152_v58  }
  0xb6   :  { %160 = vst.msk [vmem:[#allocation0] sm:$0x1] %vm159_vm10, %v158_v59  }
  0xb7   :  { %166 = vst.msk [vmem:[#allocation0] sm:$0x1] %vm165_vm11, %v164_v52  }
  0xbc   :  { %v170_v60 = vpop.permute.xlu0 %169   ;;  %v176_v61 = vpop.permute.xlu1 %175  }
  0xbd   :  { %172 = vst.msk [vmem:[#allocation0] sm:$0x1] %vm171_vm12, %v170_v60  }
  0xbe   :  { %178 = vst.msk [vmem:[#allocation0] sm:$0x1] %vm177_vm13, %v176_v61  }
  0xbf   :  { %184 = vst.msk [vmem:[#allocation0] sm:$0x1] %vm183_vm14, %v182_v55  }
  0xc4   :  { %v188_v62 = vpop.permute.xlu0 %187  }
  0xc5   :  { %190 = vst.msk [vmem:[#allocation0] sm:$0x1] %vm189_vm15, %v188_v62  }
  0xcc   :  { %v193_v63 = vld [vmem:[#allocation0] sm:$0x1] }
  0xcd   :  { %196 = vst [vmem:[%s400_s1] sm:$0x1] %v193_v63 }

</bundles_post_ra>
